<compile_context>
chip_gen: v7x
topology: tpu7x:2x2x1
jax: 0.10.0
libtpu: 0.0.40
codegen_flags: <defaults>
</compile_context>

<pallas_src>
import functools

import numpy as np
import jax
import jax.numpy as jnp
from jax import lax
from jax.experimental import pallas as pl
from jax.experimental.pallas import tpu as pltpu

KHALF = 3   # 7 // 2


def _allowed_taps():
    # Type-'B' mask for a 7x7 conv: all rows above center, plus the center row
    # up to and including the center pixel.
    return [(kh, kw) for kh in range(7) for kw in range(7)
            if kh < KHALF or (kh == KHALF and kw <= KHALF)]


@functools.lru_cache(maxsize=None)
def _roll_sign():
    """Probe the lane-rotate direction of pltpu.roll once (robust across
    jaxlib versions).  +1 means jnp.roll semantics (out[i] = in[i - shift])."""
    def probe(x_ref, o_ref):
        o_ref[...] = pltpu.roll(x_ref[...], 1, 1)

    x = lax.broadcasted_iota(jnp.int32, (8, 128), 1)
    y = pl.pallas_call(
        probe, out_shape=jax.ShapeDtypeStruct((8, 128), jnp.int32))(x)
    return 1 if int(jax.device_get(y)[0, 0]) == 127 else -1


def _make_resblock_kernel(shifts):
    """shifts: static per-tap lane-roll amounts (direction already resolved)."""

    def kernel(x_ref, w1_ref, b1_ref, w2_ref, b2_ref, w3_ref, b3_ref, m_ref,
               o_ref):
        x = x_ref[...]                                        # (C, M) lane-dense

        # tanh -> masked 1x1 conv (mask 'B' @ k=1 is all ones) -> tanh
        h1 = jnp.tanh(
            jnp.dot(w1_ref[...], jnp.tanh(x),
                    preferred_element_type=jnp.float32) + b1_ref[...])   # (Cm, M)

        # Masked 7x7 conv (type 'B'): each allowed tap is a lane roll of h1
        # (XLU), masked at image borders (VPU), feeding a small channel matmul
        # (MXU).  Four independent accumulator chains avoid one long serial
        # add dependence.
        accs = [jnp.zeros_like(h1) for _ in range(4)]
        for t, s in enumerate(shifts):
            src = h1 if s == 0 else pltpu.roll(h1, s, 1)       # out[p] <- h1[p+off]
            src = src * m_ref[t]                               # zero-pad boundaries
            accs[t % 4] = accs[t % 4] + jnp.dot(
                w2_ref[t], src, preferred_element_type=jnp.float32)
        h2 = jnp.tanh((accs[0] + accs[1]) + (accs[2] + accs[3]) + b2_ref[...])

        # masked 1x1 conv back to C channels + residual; full-lane store.
        out = jnp.dot(w3_ref[...], h2,
                      preferred_element_type=jnp.float32) + b3_ref[...]
        o_ref[...] = (x + out).astype(o_ref.dtype)

    return kernel


def resblock_pallas(x_nchw, w1_oihw, b1, w2_masked_oihw, b2, w3_oihw, b3):
    """x_nchw: (N, C, H, W) f32.  Weights in nn.Conv2d OIHW layout; w2 already
    multiplied by the type-'B' mask (only its 25 allowed taps are read)."""
    N, C, H, W = x_nchw.shape
    Cm = w1_oihw.shape[0]
    M = N * H * W                           # flattened (n, h, w) -> lane axis

    taps = _allowed_taps()
    sign = _roll_sign()

    # Static per-tap lane shifts + boundary (zero-padding) masks over the
    # flat lane index p = n*H*W + h*W + w.
    p = np.arange(M)
    hh = (p // W) % H
    ww = p % W
    shifts = []
    masks = np.zeros((len(taps), 1, M), np.float32)
    for t, (kh, kw) in enumerate(taps):
        dh, dw = kh - KHALF, kw - KHALF                     # dh <= 0
        shifts.append((sign * -(dh * W + dw)) % M)          # out[p] <- h1[p + dh*W + dw]
        masks[t, 0] = ((hh + dh >= 0) & (ww + dw >= 0)
                       & (ww + dw <= W - 1)).astype(np.float32)

    # Lane-dense activations: channels on sublanes, (n, h, w) on lanes.
    x_cm = jnp.transpose(x_nchw, (1, 0, 2, 3)).reshape(C, M)

    # Kernel-layout parameters (tiny).
    w1_k = w1_oihw[:, :, 0, 0]                                           # (Cm, C)
    w2_k = jnp.stack([w2_masked_oihw[:, :, kh, kw] for kh, kw in taps])  # (25, Cm, Cm)
    w3_k = w3_oihw[:, :, 0, 0]                                           # (C, Cm)
    b1_k = b1.reshape(Cm, 1)
    b2_k = b2.reshape(Cm, 1)
    b3_k = b3.reshape(C, 1)

    out_cm = pl.pallas_call(
        _make_resblock_kernel(tuple(shifts)),
        out_shape=jax.ShapeDtypeStruct((C, M), x_nchw.dtype),
        # Single grid step: whole (tiny) operands resident in VMEM; batch is
        # folded into the 128-lane M axis instead of a grid axis.
        in_specs=[pl.BlockSpec(memory_space=pltpu.MemorySpace.VMEM)] * 8,
        out_specs=pl.BlockSpec(memory_space=pltpu.MemorySpace.VMEM),
    )(x_cm, w1_k, b1_k, w2_k, b2_k, w3_k, b3_k, jnp.asarray(masks))

    return jnp.transpose(out_cm.reshape(C, N, H, W), (1, 0, 2, 3))   # -> NCHW


def ref_forward(x, w1_oihw, b1, w2_masked_oihw, b2, w3_oihw, b3):
    """Pure-JAX reference matching the PyTorch ResBlock forward (NCHW)."""
    dn = ('NCHW', 'OIHW', 'NCHW')
    prec = lax.Precision.HIGHEST
    h = jnp.tanh(x)
    h = lax.conv_general_dilated(h, w1_oihw, (1, 1), 'VALID',
                                 dimension_numbers=dn, precision=prec)
    h = h + b1[None, :, None, None]
    h = jnp.tanh(h)
    h = lax.conv_general_dilated(h, w2_masked_oihw, (1, 1), ((3, 3), (3, 3)),
                                 dimension_numbers=dn, precision=prec)
    h = h + b2[None, :, None, None]
    h = jnp.tanh(h)
    h = lax.conv_general_dilated(h, w3_oihw, (1, 1), 'VALID',
                                 dimension_numbers=dn, precision=prec)
    h = h + b3[None, :, None, None]
    return h + x


if __name__ == "__main__":
    N, C, H, W = 2, 8, 8, 8      # -> M = N*H*W = 128 lanes exactly
    Cm = C // 2

    key = jax.random.PRNGKey(0)
    k1, k2, k3, k4, k5, k6, kx = jax.random.split(key, 7)

    # Deterministic parameter init (nn.Conv2d OIHW convention).
    w1_oihw = jax.random.normal(k1, (Cm, C, 1, 1), jnp.float32) / np.sqrt(C)
    b1 = 0.1 * jax.random.normal(k2, (Cm,), jnp.float32)
    w2_oihw = jax.random.normal(k3, (Cm, Cm, 7, 7), jnp.float32) / np.sqrt(Cm * 49)
    b2 = 0.1 * jax.random.normal(k4, (Cm,), jnp.float32)
    w3_oihw = jax.random.normal(k5, (C, Cm, 1, 1), jnp.float32) / np.sqrt(Cm)
    b3 = 0.1 * jax.random.normal(k6, (C,), jnp.float32)

    # Type-'B' mask for the 7x7 masked conv (no color conditioning).
    mask = np.zeros((7, 7), np.float32)
    mask[:KHALF, :] = 1.0
    mask[KHALF, :KHALF + 1] = 1.0        # includes the center pixel (type 'B')
    w2_masked = w2_oihw * jnp.asarray(mask)[None, None, :, :]

    x = jax.random.normal(kx, (N, C, H, W), jnp.float32)

    out = jax.block_until_ready(
        resblock_pallas(x, w1_oihw, b1, w2_masked, b2, w3_oihw, b3))
    ref = jax.block_until_ready(
        ref_forward(x, w1_oihw, b1, w2_masked, b2, w3_oihw, b3))

    np.testing.assert_allclose(np.asarray(out), np.asarray(ref),
                               rtol=1e-4, atol=1e-4)
    print("KERNEL_OK")
</pallas_src>

<mosaic_0001>
module attributes {stable_mosaic.version = 11 : i64} {
  func.func @probe(%arg0: memref<8x128xi32, #tpu.memory_space<vmem>>, %arg1: memref<8x128xi32, #tpu.memory_space<vmem>>) attributes {dimension_semantics = [], scalar_prefetch = 0 : i64, scratch_operands = 0 : i64, tpu.core_type = #tpu.core_type<tc>} {
    %c0 = arith.constant 0 : index
    %c0_0 = arith.constant 0 : index
    %0 = vector.load %arg0[%c0, %c0_0] : memref<8x128xi32, #tpu.memory_space<vmem>>, vector<8x128xi32>
    %c1_i32 = arith.constant 1 : i32
    %1 = tpu.dynamic_rotate %0 by %c1_i32 dim 1 : vector<8x128xi32>, i32 -> vector<8x128xi32>
    %c0_1 = arith.constant 0 : index
    %c0_2 = arith.constant 0 : index
    %2 = vector.load %arg1[%c0_1, %c0_2] : memref<8x128xi32, #tpu.memory_space<vmem>>, vector<8x128xi32>
    tpu.vector_store %arg1[%c0_1, %c0_2], %1 {strides = array<i32>} : memref<8x128xi32, #tpu.memory_space<vmem>>, vector<8x128xi32>,
    return
  }
}

</mosaic_0001>

<bundles_post_ra>
// kernel: tpu_custom_call.1
= control target key start
LH: loop header
LB: loop body
LE: loop exit
PB: predicated region body
PF: predicated region fallthrough
CT: control target
= control target key end

     0   :  { %6 = vsyncpa [#allocation3], 0  ;;  %s128_s0 = inlined_call_operand.hbm [shape: s32[8,128], index: 0, kind: input, shape index: {}]   ;;  %s129_s1 = inlined_call_operand.hbm [shape: s32[8,128], index: 1, kind: output, shape index: {}]  }
   0x1   :  { %7 = vsyncpa [#allocation4], 0  ;;  %s91_s6 = smov [#allocation2]   ;;  %s43_s10 = scalar_lea.hbm %s128_s0, 128 }
   0x2   :  { %s14_s7 = sshll.u32 %s91_s6, 4  ;;  %p44_p0 = scmp.ne.s32.totalorder %s128_s0, %s43_s10  ;;  %s15_s7 = int_to_ptr.vmem [resolvable:$true] %s14_s7 }
   0x3   :  { %p47_p1 = scmp.lt.u32.totalorder %s43_s10, %s128_s0 }
   0x5   :  { %p49_p2 = pnand %p47_p1, %p44_p0 }
   0x7   :  { %52 = shalt.err (!%p49_p2)
}
   0x8   :  { %s53_s15 = scalar_lea.vmem %s15_s7, 128  ;;  %p58_p4 = scmp.lt.s32.totalorder %s15_s7, %s15_s7 }
   0x9   :  { %p54_p3 = scmp.ne.s32.totalorder %s15_s7, %s53_s15  ;;  %p59_p5 = scmp.lt.s32.totalorder %s53_s15, %s53_s15 }
   0xb   :  { %p60_p6 = por %p59_p5, %p58_p4 }
   0xd   :  { %p61_p7 = pnand %p60_p6, %p54_p3 }
   0xf   :  { %64 = shalt.err (!%p61_p7)
}
  0x10   :  { %17 = dma.hbm_to_vmem [thread:$0]  %s128_s0, 128, %s15_s7, [#allocation3]  }
  0x11   :  { %87 = dma.done.wait [#allocation3], 128  }
  0x12   :  { %88 = vsyncadd [#allocation3], 4294967168  ;;  %v21_v0 = vld [vmem:[#allocation2] sm:$0xff]  ;;  %s92_s18 = smov 1   ;;  %s93_s19 = smov [#allocation5]  }
  0x13   :  { %22 = vrot.lane.b32.xlu0 %v21_v0, %s92_s18  ;;  %s31_s20 = sshll.u32 %s93_s19, 4  ;;  %s32_s20 = int_to_ptr.vmem [resolvable:$true] %s31_s20 }
  0x14   :  { %s65_s21 = scalar_lea.vmem %s32_s20, 128  ;;  %p70_p9 = scmp.lt.s32.totalorder %s32_s20, %s32_s20 }
  0x15   :  { %p66_p8 = scmp.ne.s32.totalorder %s32_s20, %s65_s21  ;;  %p71_p10 = scmp.lt.s32.totalorder %s65_s21, %s65_s21 }
  0x17   :  { %p72_p11 = por %p71_p10, %p70_p9 }
  0x19   :  { %p73_p12 = pnand %p72_p11, %p66_p8 }
  0x85   :  { %v23_v1 = vpop.permute.xlu0 %22 }
  0x86   :  { %24 = vst [vmem:[#allocation5] sm:$0xff] %v23_v1 }
  0x87   :  { %76 = shalt.err (!%p73_p12)
}
  0x88   :  { %s77_s0 = scalar_lea.hbm %s129_s1, 128 }
  0x89   :  { %p78_p13 = scmp.ne.s32.totalorder %s129_s1, %s77_s0  ;;  %p81_p0 = scmp.lt.u32.totalorder %s77_s0, %s129_s1 }
  0x8b   :  { %p83_p1 = pnand %p81_p0, %p78_p13 }
  0x8d   :  { %86 = shalt.err (!%p83_p1)
}
  0x8e   :  { %34 = dma.vmem_to_hbm [thread:$0]  %s32_s20, 128, %s129_s1, [#allocation4]  }
  0x8f   :  { %89 = dma.done.wait [#allocation4], 128  }
  0x90   :  { %90 = vsyncadd [#allocation4], 4294967168 }
  0x91   :  { %38 = vsyncpa [#allocation3], 1 }
  0x92   :  { %39 = vsyncpa [#allocation4], 1 }

</bundles_post_ra>
